<compile_context>
chip_gen: v7x
topology: tpu7x:2x2x1
jax: 0.10.0
libtpu: 0.0.40
codegen_flags: <defaults>
</compile_context>

<pallas_src>
import jax
import jax.numpy as jnp
from jax.experimental import pallas as pl
from jax.experimental.pallas import tpu as pltpu


def _mlp_kernel(x_ref, w1_ref, b1_ref, w2_ref, b2_ref, o_ref, acc_ref):
    """One (row-tile, hidden-chunk) grid step of the MLP."""
    kh = pl.program_id(1)

    @pl.when(kh == 0)
    def _init():
        acc_ref[...] = jnp.zeros_like(acc_ref)

    # In-kernel bf16 cast of the activation tile: avoids a separate XLA astype
    # pass (full HBM read + write of x) in the wrapper; the cast hides under
    # the MXU work.
    x_bf = x_ref[...].astype(jnp.bfloat16)

    # First linear (this hidden chunk): bf16 MXU inputs, f32 accumulation.
    h = jnp.dot(x_bf, w1_ref[...], preferred_element_type=jnp.float32)
    # Bias + ReLU in f32 on the VPU.
    h = jnp.maximum(h + b1_ref[...], 0.0)
    # Second linear for this hidden chunk, accumulated into the f32 scratch.
    acc_ref[...] += jnp.dot(h.astype(jnp.bfloat16), w2_ref[...],
                            preferred_element_type=jnp.float32)

    @pl.when(kh == pl.num_programs(1) - 1)
    def _finalize():
        # Dropout(p=0.2) in eval mode == identity.
        o_ref[...] = (acc_ref[...] + b2_ref[...]).astype(o_ref.dtype)


def _pick_hidden_tile(hidden, th_max):
    """Largest multiple of 128 dividing `hidden` that is <= th_max (else hidden).

    The hidden chunk must divide H exactly: out-of-bounds reads on a
    contraction dimension are not maskable.
    """
    best = None
    th = 128
    while th <= min(hidden, th_max):
        if hidden % th == 0:
            best = th
        th += 128
    return best if best is not None else hidden


def linear_layer_forward(x, w1, b1, w2, b2, *, tm=256, th=512, out_dtype=None):
    """MLP forward.  x: (B, T, C) -> (B, T, C).

    w1: (C, H), b1: (H,), w2: (H, C), b2: (C,) with H = 4*out_features.
    Weights are stored (in, out) so the hot path is x @ W without transpose.
    out_dtype defaults to x.dtype; pass jnp.bfloat16 to halve writeback bytes
    when the downstream consumer accepts it (HBM-bound small-H configs).
    On v7x prefer a tm that yields an even number of row tiles so the
    "parallel" axis balances across both TensorCores.
    """
    B, T, C = x.shape
    H = w1.shape[1]
    M = B * T
    out_dtype = x.dtype if out_dtype is None else out_dtype

    # Free row-major view; dtype untouched (bf16 cast happens in-kernel).
    x2d = x.reshape(M, C)

    # Weights cast once (tiny vs. the activation slab); biases kept f32.
    w1 = w1.astype(jnp.bfloat16)
    w2 = w2.astype(jnp.bfloat16)
    b1 = b1.astype(jnp.float32).reshape(1, H)
    b2 = b2.astype(jnp.float32).reshape(1, C)

    # Row tile: sublane(8)-aligned; the ragged tail is handled by masked
    # stores so no padding pass over x and no slicing of the result.
    TM = max(8, min(tm, ((M + 7) // 8) * 8))
    TM = ((TM + 7) // 8) * 8
    gm = pl.cdiv(M, TM)

    # Hidden-dim chunk (multiples of 256 fill v6e/v7x's 256-wide MXU).
    TH = _pick_hidden_tile(H, th)
    kh = H // TH

    if kh == 1:
        # Constant index maps -> weights stay VMEM-resident across the whole
        # grid; single buffer halves their footprint (matters on v7x 64 MiB).
        w1_spec = pl.BlockSpec((C, TH), lambda i, k: (0, 0),
                               pipeline_mode=pl.Buffered(1))
        b1_spec = pl.BlockSpec((1, TH), lambda i, k: (0, 0),
                               pipeline_mode=pl.Buffered(1))
        w2_spec = pl.BlockSpec((TH, C), lambda i, k: (0, 0),
                               pipeline_mode=pl.Buffered(1))
    else:
        # Streamed hidden chunks: default double-buffering overlaps the next
        # chunk's weight DMA with the current matmuls.
        w1_spec = pl.BlockSpec((C, TH), lambda i, k: (0, k))
        b1_spec = pl.BlockSpec((1, TH), lambda i, k: (0, k))
        w2_spec = pl.BlockSpec((TH, C), lambda i, k: (k, 0))
    # b2 is only consumed at finalize and its index never changes.
    b2_spec = pl.BlockSpec((1, C), lambda i, k: (0, 0),
                           pipeline_mode=pl.Buffered(1))

    # Explicit VMEM budget (bytes); streamed tiles are double-buffered.
    w_bufs = 1 if kh == 1 else 2
    itemsize_x = jnp.dtype(x2d.dtype).itemsize
    itemsize_o = jnp.dtype(out_dtype).itemsize
    budget = (2 * TM * C * itemsize_x              # x tiles
              + 2 * TM * C * itemsize_o            # out tiles
              + w_bufs * 2 * (C * TH + TH * C)     # bf16 weight chunks
              + w_bufs * 4 * TH + 4 * C            # f32 bias chunks
              + 4 * TM * C                         # f32 accumulator scratch
              + 6 * TM * TH)                       # live f32 hidden + bf16 copy
    vmem_limit = int(min(64 * 1024 * 1024, max(2 * budget, 16 * 1024 * 1024)))

    out2d = pl.pallas_call(
        _mlp_kernel,
        out_shape=jax.ShapeDtypeStruct((M, C), out_dtype),
        grid_spec=pltpu.PrefetchScalarGridSpec(
            num_scalar_prefetch=0,
            grid=(gm, kh),
            in_specs=[
                # Activation row tile; constant index across the hidden axis,
                # so it is fetched once per row step.
                pl.BlockSpec((TM, C), lambda i, k: (i, 0)),
                w1_spec, b1_spec, w2_spec, b2_spec,
            ],
            out_specs=pl.BlockSpec((TM, C), lambda i, k: (i, 0)),
            scratch_shapes=[pltpu.VMEM((TM, C), jnp.float32)],
        ),
        compiler_params=pltpu.CompilerParams(
            # Row tiles are independent -> shard across both TCs on v7x;
            # hidden chunks are a reduction -> arbitrary.
            dimension_semantics=("parallel", "arbitrary"),
            vmem_limit_bytes=vmem_limit),
    )(x2d, w1, b1, w2, b2)

    return out2d.reshape(B, T, C)


if __name__ == "__main__":
    # Small but lane-aligned config: C multiple of 128 keeps loads/stores
    # lane-dense; H = 4*out_features = 512.
    in_features = 128
    out_features = 128
    hidden = out_features * 4            # 512
    B, T = 2, 72                         # M = 144 -> exercises ragged row tile

    key = jax.random.PRNGKey(0)
    kx, kw1, kb1, kw2, kb2 = jax.random.split(key, 5)

    # PyTorch nn.Linear-style uniform init bounds.
    bound1 = 1.0 / (in_features ** 0.5)
    bound2 = 1.0 / (hidden ** 0.5)
    w1 = jax.random.uniform(kw1, (in_features, hidden), jnp.float32,
                            minval=-bound1, maxval=bound1)
    b1 = jax.random.uniform(kb1, (hidden,), jnp.float32,
                            minval=-bound1, maxval=bound1)
    w2 = jax.random.uniform(kw2, (hidden, in_features), jnp.float32,
                            minval=-bound2, maxval=bound2)
    b2 = jax.random.uniform(kb2, (in_features,), jnp.float32,
                            minval=-bound2, maxval=bound2)

    x = jax.random.normal(kx, (B, T, in_features), jnp.float32)

    # Reference with identical bf16-input / f32-accumulate math (eval dropout).
    xb = x.reshape(-1, in_features).astype(jnp.bfloat16)
    w1b, w2b = w1.astype(jnp.bfloat16), w2.astype(jnp.bfloat16)
    h_ref = jnp.maximum(
        jnp.dot(xb, w1b, preferred_element_type=jnp.float32) + b1, 0.0)
    ref = (jnp.dot(h_ref.astype(jnp.bfloat16), w2b,
                   preferred_element_type=jnp.float32) + b2
           ).reshape(B, T, in_features)

    # (a) Multi-step grid on both axes: ragged M tail (tm=64 over M=144) and
    #     the hidden dim blocked into 2 streamed chunks (th=256).
    out_a = linear_layer_forward(x, w1, b1, w2, b2, tm=64, th=256)
    out_a = jax.block_until_ready(out_a)
    assert out_a.shape == (B, T, in_features)
    assert jnp.allclose(out_a, ref, atol=2e-2, rtol=2e-2), (
        float(jnp.max(jnp.abs(out_a - ref))))

    # (b) Defaults: single hidden chunk -> VMEM-resident, single-buffered
    #     weights (pl.Buffered(1) path).
    out_b = linear_layer_forward(x, w1, b1, w2, b2)
    out_b = jax.block_until_ready(out_b)
    assert out_b.shape == (B, T, in_features)
    assert jnp.allclose(out_b, ref, atol=2e-2, rtol=2e-2), (
        float(jnp.max(jnp.abs(out_b - ref))))

    print("KERNEL_OK")
</pallas_src>

<mosaic_0001>
module attributes {stable_mosaic.version = 11 : i64} {
  func.func @_mlp_kernel(%arg0: i32, %arg1: i32, %arg2: memref<64x128xf32, #tpu.memory_space<vmem>>, %arg3: memref<128x256xbf16, #tpu.memory_space<vmem>>, %arg4: memref<1x256xf32, #tpu.memory_space<vmem>>, %arg5: memref<256x128xbf16, #tpu.memory_space<vmem>>, %arg6: memref<1x128xf32, #tpu.memory_space<vmem>>, %arg7: memref<64x128xf32, #tpu.memory_space<vmem>>, %arg8: memref<64x128xf32, #tpu.memory_space<vmem>>) attributes {dimension_semantics = [#tpu.dimension_semantics<parallel>, #tpu.dimension_semantics<arbitrary>], iteration_bounds = array<i64: 3, 2>, scalar_prefetch = 0 : i64, scratch_operands = 1 : i64, tpu.core_type = #tpu.core_type<tc>, window_params = [{transform_indices = @transform_0, window_bounds = array<i64: 64, 128>}, {transform_indices = @transform_1, window_bounds = array<i64: 128, 256>}, {transform_indices = @transform_2, window_bounds = array<i64: 1, 256>}, {transform_indices = @transform_3, window_bounds = array<i64: 256, 128>}, {pipeline_mode = #tpu.pipeline_mode<synchronous>, transform_indices = @transform_4, window_bounds = array<i64: 1, 128>}, {transform_indices = @transform_5, window_bounds = array<i64: 64, 128>}]} {
    %c0_i32 = arith.constant 0 : i32
    %0 = arith.cmpi eq, %arg1, %c0_i32 : i32
    %1 = arith.extui %0 : i1 to i32
    %c0_i32_0 = arith.constant 0 : i32
    %2 = arith.cmpi ne, %1, %c0_i32_0 : i32
    scf.if %2 {
      %cst_15 = arith.constant 0.000000e+00 : f32
      %21 = vector.broadcast %cst_15 : f32 to vector<64x128xf32>
      %c0_16 = arith.constant 0 : index
      %c0_17 = arith.constant 0 : index
      %22 = vector.load %arg8[%c0_16, %c0_17] : memref<64x128xf32, #tpu.memory_space<vmem>>, vector<64x128xf32>
      tpu.vector_store %arg8[%c0_16, %c0_17], %21 {strides = array<i32>} : memref<64x128xf32, #tpu.memory_space<vmem>>, vector<64x128xf32>,
    } else {
    }
    %c0 = arith.constant 0 : index
    %c0_1 = arith.constant 0 : index
    %3 = vector.load %arg2[%c0, %c0_1] : memref<64x128xf32, #tpu.memory_space<vmem>>, vector<64x128xf32>
    %4 = arith.truncf %3 : vector<64x128xf32> to vector<64x128xbf16>
    %c0_2 = arith.constant 0 : index
    %c0_3 = arith.constant 0 : index
    %5 = vector.load %arg3[%c0_2, %c0_3] : memref<128x256xbf16, #tpu.memory_space<vmem>>, vector<128x256xbf16>
    %cst = arith.constant dense<0.000000e+00> : vector<64x256xf32>
    %6 = tpu.matmul %4, %5, %cst {dimension_numbers = #tpu.dot_dimension_numbers<[1], [0], [0], [1], [0, 0, 1, 1], [], []>} : vector<64x128xbf16>, vector<128x256xbf16>, vector<64x256xf32> -> vector<64x256xf32>
    %c0_4 = arith.constant 0 : index
    %c0_5 = arith.constant 0 : index
    %7 = vector.load %arg4[%c0_4, %c0_5] : memref<1x256xf32, #tpu.memory_space<vmem>>, vector<1x256xf32>
    %8 = vector.broadcast %7 : vector<1x256xf32> to vector<64x256xf32>
    %9 = arith.addf %6, %8 : vector<64x256xf32>
    %cst_6 = arith.constant 0.000000e+00 : f32
    %10 = vector.broadcast %cst_6 : f32 to vector<64x256xf32>
    %11 = arith.maximumf %9, %10 : vector<64x256xf32>
    %c0_7 = arith.constant 0 : index
    %c0_8 = arith.constant 0 : index
    %12 = vector.load %arg8[%c0_7, %c0_8] : memref<64x128xf32, #tpu.memory_space<vmem>>, vector<64x128xf32>
    %13 = arith.truncf %11 : vector<64x256xf32> to vector<64x256xbf16>
    %c0_9 = arith.constant 0 : index
    %c0_10 = arith.constant 0 : index
    %14 = vector.load %arg5[%c0_9, %c0_10] : memref<256x128xbf16, #tpu.memory_space<vmem>>, vector<256x128xbf16>
    %cst_11 = arith.constant dense<0.000000e+00> : vector<64x128xf32>
    %15 = tpu.matmul %13, %14, %cst_11 {dimension_numbers = #tpu.dot_dimension_numbers<[1], [0], [0], [1], [0, 0, 1, 1], [], []>} : vector<64x256xbf16>, vector<256x128xbf16>, vector<64x128xf32> -> vector<64x128xf32>
    %16 = arith.addf %12, %15 : vector<64x128xf32>
    %c0_12 = arith.constant 0 : index
    %c0_13 = arith.constant 0 : index
    %17 = vector.load %arg8[%c0_12, %c0_13] : memref<64x128xf32, #tpu.memory_space<vmem>>, vector<64x128xf32>
    tpu.vector_store %arg8[%c0_12, %c0_13], %16 {strides = array<i32>} : memref<64x128xf32, #tpu.memory_space<vmem>>, vector<64x128xf32>,
    %c1_i32 = arith.constant 1 : i32
    %18 = arith.cmpi eq, %arg1, %c1_i32 : i32
    %19 = arith.extui %18 : i1 to i32
    %c0_i32_14 = arith.constant 0 : i32
    %20 = arith.cmpi ne, %19, %c0_i32_14 : i32
    scf.if %20 {
      %c0_15 = arith.constant 0 : index
      %c0_16 = arith.constant 0 : index
      %21 = vector.load %arg8[%c0_15, %c0_16] : memref<64x128xf32, #tpu.memory_space<vmem>>, vector<64x128xf32>
      %c0_17 = arith.constant 0 : index
      %c0_18 = arith.constant 0 : index
      %22 = vector.load %arg6[%c0_17, %c0_18] : memref<1x128xf32, #tpu.memory_space<vmem>>, vector<1x128xf32>
      %23 = vector.broadcast %22 : vector<1x128xf32> to vector<64x128xf32>
      %24 = arith.addf %21, %23 : vector<64x128xf32>
      %c0_19 = arith.constant 0 : index
      %c0_20 = arith.constant 0 : index
      %25 = vector.load %arg7[%c0_19, %c0_20] : memref<64x128xf32, #tpu.memory_space<vmem>>, vector<64x128xf32>
      tpu.vector_store %arg7[%c0_19, %c0_20], %24 {strides = array<i32>} : memref<64x128xf32, #tpu.memory_space<vmem>>, vector<64x128xf32>,
    } else {
    }
    return
  }
  func.func @transform_0(%arg0: i32, %arg1: i32) -> (i32, i32) {
    %c0_i32 = arith.constant 0 : i32
    %c0_i32_0 = arith.constant 0 : i32
    return %arg0, %c0_i32 : i32, i32
  }
  func.func @transform_1(%arg0: i32, %arg1: i32) -> (i32, i32) {
    %c0_i32 = arith.constant 0 : i32
    %c0_i32_0 = arith.constant 0 : i32
    return %c0_i32, %arg1 : i32, i32
  }
  func.func @transform_2(%arg0: i32, %arg1: i32) -> (i32, i32) {
    %c0_i32 = arith.constant 0 : i32
    %c0_i32_0 = arith.constant 0 : i32
    return %c0_i32, %arg1 : i32, i32
  }
  func.func @transform_3(%arg0: i32, %arg1: i32) -> (i32, i32) {
    %c0_i32 = arith.constant 0 : i32
    %c0_i32_0 = arith.constant 0 : i32
    return %arg1, %c0_i32 : i32, i32
  }
  func.func @transform_4(%arg0: i32, %arg1: i32) -> (i32, i32) {
    %c0_i32 = arith.constant 0 : i32
    %c0_i32_0 = arith.constant 0 : i32
    %c0_i32_1 = arith.constant 0 : i32
    return %c0_i32, %c0_i32_0 : i32, i32
  }
  func.func @transform_5(%arg0: i32, %arg1: i32) -> (i32, i32) {
    %c0_i32 = arith.constant 0 : i32
    %c0_i32_0 = arith.constant 0 : i32
    return %arg0, %c0_i32 : i32, i32
  }
}

</mosaic_0001>

<bundles_post_ra>
// kernel: tpu_custom_call.1
= control target key start
LH: loop header
LB: loop body
LE: loop exit
PB: predicated region body
PF: predicated region fallthrough
CT: control target
= control target key end

     0   :  { %s1947_s0 = inlined_call_operand.hbm [shape: f32[144,128], index: 0, kind: input, shape index: {}]   ;;  %s1948_s1 = inlined_call_operand.hbm [shape: bf16[128,512], index: 1, kind: input, shape index: {}]   ;;  %s1949_s2 = inlined_call_operand.vmem [shape: f32[1,512], index: 2, kind: input, shape index: {}]   ;;  %s1950_s3 = inlined_call_operand.hbm [shape: bf16[512,128], index: 3, kind: input, shape index: {}]   ;;  %s1951_s4 = inlined_call_operand.vmem [shape: f32[1,128], index: 4, kind: input, shape index: {}]   ;;  %s1952_s5 = inlined_call_operand.hbm [shape: f32[144,128], index: 5, kind: output, shape index: {}]  }
   0x1   :  { %1961 = sst [smem:[#allocation21_spill]] %s1947_s0 }
   0x2   :  { %10 = vsyncpa [#allocation4], 0 }
   0x3   :  { %12 = vsyncpa [#allocation4 + $0x1], 0 }
   0x4   :  { %13 = vsyncpa [#allocation7], 0 }
   0x5   :  { %15 = vsyncpa [#allocation7 + $0x1], 0 }
   0x6   :  { %16 = vsyncpa [#allocation5], 0 }
   0x7   :  { %18 = vsyncpa [#allocation5 + $0x1], 0  ;;  %s1525_s18 = smov 0   ;;  %s1527_s19 = smov 0  }
   0x8   :  { %s1529_s20 = smov 0   ;;  %s1531_s21 = smov 0  }
   0x9   :  { %s1533_s22 = smov 0   ;;  %s1535_s23 = smov 0  }
   0xa   :  { %s1537_s24 = smov 0   ;;  %s1539_s25 = smov 0  }
   0xb   :  { %s1541_s26 = smov 0   ;;  %s1543_s27 = smov 0  }
   0xc   :  { %s1545_s28 = smov 0  }
   0xd LB: > { %1962 = sst [smem:[#allocation13_spill]] %s1450_s21  ;;  %s1581_s29 = sadd.s32 4294967295, %s1478_s28   ;;  %s1478_s28 = sphi %s1545_s28, %s24_s28   ;;  %s1474_s27 = sphi %s1543_s27, %s1988_s27   ;;  %s1470_s26 = sphi %s1541_s26, %s1995_s26   ;;  %s1466_s25 = sphi %s1539_s25, %s1986_s25   ;;  %s1462_s24 = sphi %s1537_s24, %s1994_s24   ;;  %s1458_s23 = sphi %s1535_s23, %s1985_s23   ;;  %s1454_s22 = sphi %s1533_s22, %s1993_s22   ;;  %s1450_s21 = sphi %s1531_s21, %s1992_s21   ;;  %s1446_s20 = sphi %s1529_s20, %s1991_s20   ;;  %s1442_s19 = sphi %s1527_s19, %s1990_s19   ;;  %s1438_s18 = sphi %s1525_s18, %s1989_s18  }
   0xe   : > { %1963 = sst [smem:[#allocation14_spill]] %s1458_s23  ;;  %s1008_s30 = sadd.s32 4294967294, %s1478_s28  }
   0xf   : > { %1964 = sst [smem:[#allocation15_spill]] %s1474_s27  ;;  %s33_s6 = sadd.s32 1, %s1470_s26 }
  0x10   : > { %s36_s7 = sadd.s32 1, %s1474_s27  ;;  %p34_p0 = scmp.ge.s32.totalorder %s33_s6, 2 }
  0x11   : > { %s43_s8 = sadd.s32 1, %s1458_s23  ;;  %p50_p1 = scmp.ne.s32.totalorder %s1458_s23, %s1454_s22 }
  0x12   : > { %p51_p2 = scmp.eq.s32.totalorder %s1478_s28, 0  ;;  %s1997_s6 = smov (%p34_p0, %s33_s6), 0 }
  0x13   : > { %1965 = sst [smem:[#allocation16_spill]] %s1997_s6  ;;  %s1999_s7 = smov (!%p34_p0, %s36_s7), %s1474_s27 }
  0x14   : > { %p1598_p3 = por %p51_p2, %p50_p1  ;;  %p1953_p4 = scmp.ne.s32.totalorder %s1454_s22, %s1450_s21 }
  0x15   : > { %p38_p5 = scmp.ge.s32.totalorder %s1999_s7, 3  ;;  %p57_p6 = scmp.eq.s32.totalorder %s1581_s29, 0 }
  0x16   : > { %s66_s10 = ssub.s32 %s1470_s26, %s1997_s6  ;;  %s69_s11 = sadd.s32 1, %s1446_s20 }
  0x17   : > { %s2001_s7 = smov (%p38_p5, %s1999_s7), 0  ;;  %p1615_p7 = por %p57_p6, %p1953_p4 }
  0x18   : > { %1967 = sst [smem:[#allocation17_spill]] %s2001_s7  ;;  %p67_p8 = scmp.eq.s32.totalorder %s66_s10, 0 }
  0x19   : > { %s40_s13 = ssub.s32 %s1474_s27, %s2001_s7  ;;  %p76_p9 = scmp.ne.s32.totalorder %s1446_s20, %s1442_s19 }
  0x1a   : > { %p41_p10 = scmp.eq.s32.totalorder %s40_s13, 0  ;;  %p82_p11 = scmp.ne.s32.totalorder %s1442_s19, %s1438_s18 }
  0x1b   : > { %s1626_s14 = scalar_select %p67_p8, %s1446_s20, %s69_s11  }
  0x1c   : > { %s1629_s15 = scalar_select %p41_p10, %s1458_s23, %s43_s8  }
  0x1d   : > { %1969 = sst [smem:[#allocation18_spill]] %s1626_s14  ;;  %p1633_p12 = por %p76_p9, %p51_p2 }
  0x1e   : > { %1970 = sst [smem:[#allocation19_spill]] %s1629_s15  ;;  %p1639_p13 = por %p82_p11, %p57_p6 }
  0x1f   : > { %p179_p0 = scmp.eq.s32.totalorder %s1581_s29, 5  ;;  %p185_p5 = scmp.eq.s32.totalorder %s1008_s30, 5 }
  0x20   : > { %s1972_s17 = scalar_select %p1639_p13, 1, 0 }
  0x21   : > { %p1647_p4 = por %p179_p0, %p50_p1  ;;  %p1974_p8 = scmp.ne.s32.totalorder %s1454_s22, %s1450_s21 }
  0x22   : > { %p1010_p2 = scmp.ge.s32.totalorder %s1478_s28, 6 }
  0x23   : > { %s1973_s10 = scalar_select %p1647_p4, 1, 0 }
  0x24   : > { %p1654_p10 = por %p185_p5, %p1974_p8  ;;  %204 = sbr.rel (%p1010_p2) target bundleno = 135 (0x87), region = 20 }
  0x26   : > { %s1975_s18 = scalar_select %p1654_p10, 1, 0 }
  0x28   : > { %1976 = sst [smem:[#allocation20_spill]] %s1975_s18 }
  0x2b   : > { %207 = sbr.rel (!%p1598_p3) target bundleno = 83 (0x53), region = 24  ;;  %s208_s8 = sand.u32 (%p1598_p3), 1, %s1458_s23  }
  0x2c   : > { %s1012_s30 = sshll.u32 (%p1598_p3), %s1474_s27, 3  ;;  %s1011_s11 = sshll.u32 (%p1598_p3), %s208_s8, 6 }
  0x2d   : > { %s214_s13 = ssub.s32 (%p1598_p3), 18, %s1012_s30  ;;  %s1666_s15 = scalar_lea.sflag (%p1598_p3), [#allocation4], %s208_s8 }
  0x2e   : > { %p215_p1 = scmp.lt.s32.totalorder (%p1598_p3), %s214_s13, 8  ;;  %s212_s14 = scalar_lea.vmem (%p1598_p3), [#allocation3], %s1011_s11 }
  0x32   : > { %s2003_s13 = smov (!%p215_p1, %s214_s13), 8 }
  0x33   : > { %s1663_s7 = sshll.u32 %s2003_s13, 7 }
  0x34   : > { %s219_s6 = ssub.s32 1024, %s1663_s7 }
  0x35   : > { %220 = vsyncadd %s1666_s15, %s219_s6  ;;  %p1014_p3 = scmp.ne.s32.totalorder %s1663_s7, 0  ;;  %s1074_s9 = sshll.u32 %s1474_s27, 10 }
  0x36   : > { %s1977_s0 = sld [smem:[#allocation21_spill]]  ;;  %s225_s8 = sshll.u32 %s212_s14, 4  ;;  %s1676_s8 = int_to_ptr.vmem [resolvable:$true] %s225_s8 }
  0x3c   : > { %s1674_s30 = scalar_lea.hbm %s1977_s0, %s1074_s9  ;;  %s1272_s27 = scalar_lea.hbm %s1977_s0, 2304 }
  0x3d   : > { %s1268_s11 = scalar_lea.hbm %s1674_s30, %s1663_s7  ;;  %p1273_p0 = scmp.lt.u32.totalorder %s1674_s30, %s1977_s0 }
  0x3e   : > { %p1269_p6 = scmp.ne.s32.totalorder %s1674_s30, %s1268_s11  ;;  %p1274_p5 = scmp.lt.u32.totalorder %s1272_s27, %s1268_s11 }
  0x3f   : > { %p1276_p2 = scmp.lt.u32.totalorder %s1268_s11, %s1674_s30 }
  0x40   : > { %p1270_p9 = pnand %p1269_p6, %p1014_p3  ;;  %p1275_p8 = por %p1274_p5, %p1273_p0 }
  0x42   : > { %p1271_p11 = pneg %p1270_p9  ;;  %p1277_p1 = por %p1276_p2, %p1275_p8 }
  0x44   : > { %p1278_p10 = pnand %p1277_p1, %p1271_p11 }
  0x46   : > { %1281 = shalt.err (!%p1278_p10)
}
  0x47   : > { %s1282_s14 = scalar_lea.vmem %s1676_s8, %s1663_s7  ;;  %s1480_s18 = smov [#allocation3]  }
  0x48   : > { %p1283_p6 = scmp.ne.s32.totalorder %s1676_s8, %s1282_s14  ;;  %s1286_s9 = sshll.u32 %s1480_s18, 4  ;;  %s1287_s9 = int_to_ptr.vmem [resolvable:$false] %s1286_s9 }
  0x49   : > { %s1288_s21 = scalar_lea.vmem %s1287_s9, 2048  ;;  %p1289_p13 = scmp.lt.s32.totalorder %s1676_s8, %s1287_s9 }
  0x4a   : > { %p1284_p9 = pnand %p1283_p6, %p1014_p3  ;;  %p1290_p0 = scmp.lt.s32.totalorder %s1288_s21, %s1282_s14 }
  0x4c   : > { %p1285_p4 = pneg %p1284_p9  ;;  %p1291_p5 = por %p1290_p0, %p1289_p13 }
  0x4e   : > { %p1292_p8 = pnand %p1291_p5, %p1285_p4 }
  0x50   : > { %1295 = shalt.err (!%p1292_p8)
}
  0x51   : > { %s1481_s27 = smov 128   ;;  %s1482_s11 = smov 8  }
  0x52   : > { %231 = dma.hbm_to_vmem [thread:$0]  (%p1014_p3), %s1674_s30, %s1663_s7, %s1676_s8, %s1666_s15, %s1481_s27, %s1481_s27, %s1482_s11  }
  0x53 PF: > { %s235_s6 = sand.u32 1, %s1478_s28   ;;  %s237_s13 = sand.u32 1, %s1446_s20  }
  0x54   : > { %s1705_s23 = sshll.u32 %s237_s13, 7  ;;  %s1075_s14 = sshll.u32 %s1470_s26, 7 }
  0x55   : > { %s1711_s21 = scalar_lea.hbm %s1948_s1, %s1075_s14  ;;  %s239_s7 = scalar_lea.vmem [#allocation6], %s1705_s23 }
  0x56   : > { %s246_s15 = sshll.u32 %s239_s7, 4  ;;  %s1716_s30 = scalar_lea.sflag [#allocation7], %s235_s6  ;;  %s1714_s15 = int_to_ptr.vmem [resolvable:$true] %s246_s15 }
  0x57   : > { %s1296_s8 = scalar_lea.hbm %s1711_s21, 2048  ;;  %s1300_s13 = scalar_lea.hbm %s1948_s1, 4096 }
  0x58   : > { %p1297_p4 = scmp.ne.s32.totalorder %s1711_s21, %s1296_s8  ;;  %p1301_p3 = scmp.lt.u32.totalorder %s1711_s21, %s1948_s1 }
  0x59   : > { %p1302_p11 = scmp.lt.u32.totalorder %s1300_s13, %s1296_s8  ;;  %p1304_p1 = scmp.lt.u32.totalorder %s1296_s8, %s1711_s21 }
  0x5a   : > { %p1298_p13 = pnand %p1297_p4, %p1633_p12 }
  0x5b   : > { %p1303_p2 = por %p1302_p11, %p1301_p3 }
  0x5c   : > { %p1299_p10 = pneg %p1298_p13 }
  0x5d   : > { %p1305_p6 = por %p1304_p1, %p1303_p2 }
  0x5f   : > { %p1306_p9 = pnand %p1305_p6, %p1299_p10 }
  0x61   : > { %1309 = shalt.err (!%p1306_p9)
}
  0x62   : > { %s1310_s6 = scalar_lea.vmem %s1714_s15, 2048  ;;  %s1483_s9 = smov [#allocation6]  }
  0x63   : > { %p1311_p0 = scmp.ne.s32.totalorder %s1714_s15, %s1310_s6  ;;  %s1314_s7 = sshll.u32 %s1483_s9, 4  ;;  %s1315_s7 = int_to_ptr.vmem [resolvable:$false] %s1314_s7 }
  0x64   : > { %s1316_s27 = scalar_lea.vmem %s1315_s7, 4096  ;;  %p1317_p4 = scmp.lt.s32.totalorder %s1714_s15, %s1315_s7 }
  0x65   : > { %p1312_p5 = pnand %p1311_p0, %p1633_p12  ;;  %p1318_p13 = scmp.lt.s32.totalorder %s1316_s27, %s1310_s6 }
  0x67   : > { %p1313_p8 = pneg %p1312_p5  ;;  %p1319_p3 = por %p1318_p13, %p1317_p4 }
  0x69   : > { %p1320_p11 = pnand %p1319_p3, %p1313_p8 }
  0x6b   : > { %1323 = shalt.err (!%p1320_p11)
}
  0x6c   : > { %s1484_s8 = smov 256   ;;  %s1485_s11 = smov 128  }
  0x6d   : > { %s1486_s13 = smov 8   ;;  %s1076_s14 = sshll.u32 %s1470_s26, 11 }
  0x6e   : > { %1118 = dma.hbm_to_vmem [thread:$0]  (%p1633_p12), %s1711_s21, 2048, %s1714_s15, %s1716_s30, %s1484_s8, %s1485_s11, %s1486_s13  }
  0x6f   : > { %s1744_s6 = scalar_lea.hbm %s1950_s3, %s1076_s14  ;;  %s268_s7 = scalar_lea.vmem [#allocation8], %s1705_s23 }
  0x70   : > { %s275_s27 = sshll.u32 %s268_s7, 4  ;;  %s1324_s0 = scalar_lea.hbm %s1744_s6, 2048  ;;  %s1747_s27 = int_to_ptr.vmem [resolvable:$true] %s275_s27 }
  0x71   : > { %p1325_p10 = scmp.ne.s32.totalorder %s1744_s6, %s1324_s0  ;;  %s1328_s8 = scalar_lea.hbm %s1950_s3, 4096 }
  0x72   : > { %p1329_p6 = scmp.lt.u32.totalorder %s1744_s6, %s1950_s3  ;;  %p1330_p9 = scmp.lt.u32.totalorder %s1328_s8, %s1324_s0 }
  0x73   : > { %p1326_p2 = pnand %p1325_p10, %p1633_p12  ;;  %p1332_p5 = scmp.lt.u32.totalorder %s1324_s0, %s1744_s6 }
  0x74   : > { %p1331_p0 = por %p1330_p9, %p1329_p6 }
  0x75   : > { %p1327_p1 = pneg %p1326_p2 }
  0x76   : > { %p1333_p8 = por %p1332_p5, %p1331_p0 }
  0x78   : > { %p1334_p4 = pnand %p1333_p8, %p1327_p1 }
  0x7a   : > { %1337 = shalt.err (!%p1334_p4)
}
  0x7b   : > { %s1338_s23 = scalar_lea.vmem %s1747_s27, 2048  ;;  %s1487_s14 = smov [#allocation8]  }
  0x7c   : > { %p1339_p13 = scmp.ne.s32.totalorder %s1747_s27, %s1338_s23  ;;  %s1342_s18 = sshll.u32 %s1487_s14, 4  ;;  %s1343_s18 = int_to_ptr.vmem [resolvable:$false] %s1342_s18 }
  0x7d   : > { %s1344_s9 = scalar_lea.vmem %s1343_s18, 4096  ;;  %p1345_p10 = scmp.lt.s32.totalorder %s1747_s27, %s1343_s18 }
  0x7e   : > { %p1340_p3 = pnand %p1339_p13, %p1633_p12  ;;  %p1346_p2 = scmp.lt.s32.totalorder %s1344_s9, %s1338_s23 }
  0x80   : > { %p1341_p11 = pneg %p1340_p3  ;;  %p1347_p6 = por %p1346_p2, %p1345_p10 }
  0x82   : > { %p1348_p9 = pnand %p1347_p6, %p1341_p11 }
  0x84   : > { %1351 = shalt.err (!%p1348_p9)
}
  0x85   : > { %s1488_s0 = smov 64   ;;  %s1489_s7 = smov 4  }
  0x86   : > { %1119 = dma.hbm_to_vmem [thread:$0]  (%p1633_p12), %s1744_s6, 2048, %s1747_s27, %s1716_s30, %s1488_s0, %s1488_s0, %s1489_s7  }
  0x87 PF: > { %p1024_p1 = scmp.ge.s32.totalorder %s1478_s28, 1  ;;  %p283_p0 = scmp.lt.s32.totalorder %s1478_s28, 7 }
  0x89   : > { %p284_p5 = pnand %p1024_p1, %p283_p0 }
  0x8a   : > { %s1774_s21 = sand.u32 (!%p284_p5), 1, %s1454_s22  }
  0x8b   : > { %287 = sbr.rel (%p284_p5) target bundleno = 709 (0x2c5), region = 40  ;;  %s1025_s15 = sshll.u32 (!%p284_p5), %s1774_s21, 6 }
  0x8c   : > { %s290_s8 = scalar_lea.sflag (!%p284_p5), [#allocation4], %s1774_s21  ;;  %s1778_s11 = scalar_lea.vmem (!%p284_p5), [#allocation3], %s1025_s15 }
  0x92   : > { %1425 = dma.done.wait (%p1615_p7), %s290_s8, 1024  }
  0x93   : > { %1427 = vsyncadd (%p1615_p7), %s290_s8, 4294966272  ;;  %s298_s16 = sand.u32 1, %s1581_s29   ;;  %s300_s30 = sand.u32 1, %s1442_s19  }
  0x94   : > { %s1026_s6 = sshll.u32 %s300_s30, 7  ;;  %s299_s27 = scalar_lea.sflag [#allocation7], %s298_s16 }
  0x95   : > { %s1786_s13 = scalar_lea.vmem [#allocation6], %s1026_s6  ;;  %p1978_p12 = scmp.ne.s32.totalorder %s1972_s17, 0 }
  0x97   : > { %1429 = dma.done.wait (%p1978_p12), %s299_s27, 4096  }
  0x98   : > { %1431 = vsyncadd (%p1978_p12), %s299_s27, 4294963200  ;;  %s1029_s23 = sshll.u32 %s1462_s24, 1  ;;  %s1799_s18 = scalar_lea.vmem [#allocation8], %s1026_s6 }
  0x99   : > { %p359_p8 = scmp.lt.s32.totalorder %s1029_s23, 3  ;;  %s1801_s9 = scalar_lea.vmem [#allocation9], %s1025_s15 }
  0x9a   : > { %p1030_p7 = scmp.ne.s32.totalorder %s1462_s24, 0 }
  0x9b   : > { %s2005_s23 = smov (!%p359_p8, %s1029_s23), 3  ;;  %v1490_v0 = vmov (!%p1030_p7), 0.0  }
  0x9c   : > { %s361_s29 = scalar_lea.vmem %s1949_s2, %s2005_s23  ;;  %373 = sbr.rel (%p1030_p7) target bundleno = 163 (0xa3), region = 56  ;;  %374 = vst [vmem:[#allocation2] sm:$0xff] (!%p1030_p7), %v1490_v0  ;;  %375 = vst [vmem:[#allocation2 + $0x8] sm:$0xff] (!%p1030_p7), %v1490_v0 }
  0x9d   : > { %376 = vst [vmem:[#allocation2 + $0x10] sm:$0xff] (!%p1030_p7), %v1490_v0  ;;  %377 = vst [vmem:[#allocation2 + $0x18] sm:$0xff] (!%p1030_p7), %v1490_v0 }
  0x9e   : > { %378 = vst [vmem:[#allocation2 + $0x20] sm:$0xff] (!%p1030_p7), %v1490_v0  ;;  %379 = vst [vmem:[#allocation2 + $0x28] sm:$0xff] (!%p1030_p7), %v1490_v0 }
  0x9f   : > { %380 = vst [vmem:[#allocation2 + $0x30] sm:$0xff] (!%p1030_p7), %v1490_v0  ;;  %381 = vst [vmem:[#allocation2 + $0x38] sm:$0xff] (!%p1030_p7), %v1490_v0 }
  0xa3 PF: > { %v1228_v1 = vld [vmem:[%s1786_s13 + $0x4] ss:$8 sps:$4 sm:$0xff]   ;;  %v1230_v2 = vld [vmem:[%s1786_s13] ss:$8 sps:$4 sm:$0xff]   ;;  %v1491_v3 = vmov 0   ;;  %v1256_v17 = vld [vmem:[%s1799_s18 + $0x50] sm:$0xff]   ;;  %v412_v46 = vlaneseq }
  0xa4   : > { %534 = vmatprep.mubr.bf16.mxu0 %v1491_v3  ;;  %502 = vmatprep.subr.bf16.mxu0 %v1228_v1  ;;  %v1231_v4 = vld [vmem:[%s1786_s13 + $0x14] ss:$8 sps:$4 sm:$0xff]   ;;  %v1233_v5 = vld [vmem:[%s1786_s13 + $0x10] ss:$8 sps:$4 sm:$0xff]   ;;  %v1234_v6 = vld [vmem:[%s1786_s13 + $0x24] ss:$8 sps:$4 sm:$0xff]  }
  0xa5   : > { %503 = vmatpush1.bf16.msra.mxu0 %v1230_v2  ;;  %v1236_v7 = vld [vmem:[%s1786_s13 + $0x20] ss:$8 sps:$4 sm:$0xff]   ;;  %v1237_v8 = vld [vmem:[%s1786_s13 + $0x34] ss:$8 sps:$4 sm:$0xff]   ;;  %v1239_v9 = vld [vmem:[%s1786_s13 + $0x30] ss:$8 sps:$4 sm:$0xff]  }
  0xa6   : > { %504 = vmatprep.subr.bf16.mxu0 %v1231_v4  ;;  %v1240_v10 = vld [vmem:[%s1786_s13 + $0x44] ss:$8 sps:$4 sm:$0xff]   ;;  %v1242_v11 = vld [vmem:[%s1786_s13 + $0x40] ss:$8 sps:$4 sm:$0xff]   ;;  %v1243_v12 = vld [vmem:[%s1786_s13 + $0x54] ss:$8 sps:$4 sm:$0xff]  }
  0xa7   : > { %v1252_v13 = vld [vmem:[%s1799_s18 + $0x40] sm:$0xff]   ;;  %v1254_v15 = vld [vmem:[%s1799_s18 + $0x48] sm:$0xff]   ;;  %v1245_v18 = vld [vmem:[%s1786_s13 + $0x50] ss:$8 sps:$4 sm:$0xff]   ;;  %v413_v47 = vshrl.u32 %v412_v46, 7  ;;  %p1063_p4 = scmp.ne.s32.totalorder %s1462_s24, 1 }
  0xa8   : > { %v1253_v14 = vld [vmem:[%s1799_s18] sm:$0xff]   ;;  %1078 = vmatprep.subr.bf16.mxu1 %v1252_v13  ;;  %v1255_v16 = vld [vmem:[%s1799_s18 + $0x8] sm:$0xff]   ;;  %v1257_v21 = vld [vmem:[%s1799_s18 + $0x10] sm:$0xff]  }
  0xa9   : > { %505 = vmatpush1.bf16.msra.mxu0 %v1233_v5  ;;  %1079 = vmatpush3.bf16.msra.mxu1 %v1253_v14  ;;  %v1246_v19 = vld [vmem:[%s1786_s13 + $0x64] ss:$8 sps:$4 sm:$0xff]   ;;  %v1248_v20 = vld [vmem:[%s1786_s13 + $0x60] ss:$8 sps:$4 sm:$0xff]   ;;  %v1258_v22 = vld [vmem:[%s1799_s18 + $0x58] sm:$0xff]   ;;  %v414_v48 = vsub.s32 0, %v413_v47 }
  0xaa   : > { %506 = vmatprep.subr.bf16.mxu0 %v1234_v6  ;;  %1080 = vmatprep.subr.bf16.mxu1 %v1254_v15  ;;  %v1249_v23 = vld [vmem:[%s1786_s13 + $0x74] ss:$8 sps:$4 sm:$0xff]   ;;  %v1260_v25 = vld [vmem:[%s1799_s18 + $0x60] sm:$0xff]   ;;  %v1251_v26 = vld [vmem:[%s1786_s13 + $0x70] ss:$8 sps:$4 sm:$0xff]   ;;  %v418_v50 = vsub.s32 1, %v413_v47 }
  0xab   : > { %v1259_v24 = vld [vmem:[%s1799_s18 + $0x18] sm:$0xff]   ;;  %v382_v27 = vld [vmem:[%s1778_s11] sm:$0xff]  ;;  %v383_v28 = vld [vmem:[%s1778_s11 + $0x8] sm:$0xff] }
  0xac   : > { %v1261_v29 = vld [vmem:[%s1799_s18 + $0x20] sm:$0xff]   ;;  %v390_v30 = vpack.c.bf16 %v383_v28, %v382_v27  ;;  %v1262_v31 = vld [vmem:[%s1799_s18 + $0x68] sm:$0xff]   ;;  %v384_v32 = vld [vmem:[%s1778_s11 + $0x10] sm:$0xff] }
  0xad   : > { %507 = vmatpush1.bf16.msra.mxu0 %v1236_v7  ;;  %1081 = vmatpush3.bf16.msra.mxu1 %v1255_v16  ;;  %v385_v33 = vld [vmem:[%s1778_s11 + $0x18] sm:$0xff]  ;;  %v386_v35 = vld [vmem:[%s1778_s11 + $0x20] sm:$0xff]  ;;  %v387_v36 = vld [vmem:[%s1778_s11 + $0x28] sm:$0xff] }
  0xae   : > { %508 = vmatprep.subr.bf16.mxu0 %v1237_v8  ;;  %1082 = vmatprep.subr.bf16.mxu1 %v1256_v17  ;;  %v391_v34 = vpack.c.bf16 %v385_v33, %v384_v32  ;;  %v392_v37 = vpack.c.bf16 %v387_v36, %v386_v35  ;;  %v388_v38 = vld [vmem:[%s1778_s11 + $0x30] sm:$0xff]  ;;  %v389_v39 = vld [vmem:[%s1778_s11 + $0x38] sm:$0xff]  ;;  %v1263_v41 = vld [vmem:[%s1799_s18 + $0x28] sm:$0xff]  }
  0xaf   : > { %v393_v40 = vpack.c.bf16 %v389_v39, %v388_v38  ;;  %v1264_v42 = vld [vmem:[%s1799_s18 + $0x70] sm:$0xff]   ;;  %v1266_v44 = vld [vmem:[%s1799_s18 + $0x78] sm:$0xff]   ;;  %v410_v49 = vld [vmem:[%s361_s29] sm:$0x3] }
  0xb0   : > { %v1265_v43 = vld [vmem:[%s1799_s18 + $0x30] sm:$0xff]   ;;  %v1267_v45 = vld [vmem:[%s1799_s18 + $0x38] sm:$0xff]   ;;  %v415_v51 = vrot.slane %v410_v49, %v414_v48  ;;  %v419_v52 = vrot.slane %v410_v49, %v418_v50  ;;  %v591_v46 = vld [vmem:[#allocation2] sm:$0xff] }
  0xb1   : > { %509 = vmatpush1.bf16.msra.mxu0 %v1239_v9  ;;  %1083 = vmatpush3.bf16.msra.mxu1 %v1257_v21  ;;  %v592_v50 = vld [vmem:[#allocation2 + $0x8] sm:$0xff] }
  0xb2   : > { %510 = vmatprep.subr.bf16.mxu0 %v1240_v10  ;;  %1084 = vmatprep.subr.bf16.mxu1 %v1258_v22 }
  0xb5   : > { %511 = vmatpush1.bf16.msra.mxu0 %v1242_v11  ;;  %1085 = vmatpush3.bf16.msra.mxu1 %v1259_v24 }
  0xb6   : > { %512 = vmatprep.subr.bf16.mxu0 %v1243_v12  ;;  %1086 = vmatprep.subr.bf16.mxu1 %v1260_v25 }
  0xb9   : > { %513 = vmatpush1.bf16.msra.mxu0 %v1245_v18  ;;  %1087 = vmatpush3.bf16.msra.mxu1 %v1261_v29 }
  0xba   : > { %514 = vmatprep.subr.bf16.mxu0 %v1246_v19  ;;  %1088 = vmatprep.subr.bf16.mxu1 %v1262_v31 }
  0xbd   : > { %515 = vmatpush1.bf16.msra.mxu0 %v1248_v20  ;;  %1089 = vmatpush3.bf16.msra.mxu1 %v1263_v41 }
  0xbe   : > { %516 = vmatprep.subr.bf16.mxu0 %v1249_v23  ;;  %1090 = vmatprep.subr.bf16.mxu1 %v1264_v42 }
  0xc1   : > { %517 = vmatpush1.bf16.msra.mxu0 %v1251_v26  ;;  %1091 = vmatpush3.bf16.msra.mxu1 %v1265_v43 }
  0xc2   : > { %1092 = vmatprep.subr.bf16.mxu1 %v1266_v44 }
  0xc4   : > { %535 = vmatmul.mubr.bf16.vlgmr.msra.gmra.mrb[0].mxu0 %v390_v30 }
  0xc5   : > { %544 = vmatprep.mubr.bf16.mxu0 %v1491_v3  ;;  %1093 = vmatpush3.bf16.msra.mxu1 %v1267_v45 }
  0xcc   : > { %545 = vmatmul.mubr.bf16.gmra.mrb[4].mxu0 %v391_v34 }
  0xcd   : > { %554 = vmatprep.mubr.bf16.mxu0 %v1491_v3 }
  0xd4   : > { %555 = vmatmul.mubr.bf16.gmra.mrb[8].mxu0 %v392_v37 }
  0xd5   : > { %564 = vmatprep.mubr.bf16.mxu0 %v1491_v3 }
  0xdc   : > { %565 = vmatmul.mubr.bf16.gmra.mrb[12].mxu0 %v393_v40 }
 0x197   : > { %v536_v53 = vpop.f32.mrb[0].mxu0 }
 0x198   : > { %v537_v54 = vadd.f32 %v536_v53, %v415_v51  ;;  %v538_v55 = vpop.f32.mrb[1].mxu0 }
 0x199   : > { %v539_v56 = vadd.f32 %v538_v55, %v419_v52  ;;  %v540_v57 = vpop.f32.mrb[2].mxu0 }
 0x19a   : > { %v541_v58 = vadd.f32 %v540_v57, %v415_v51  ;;  %v542_v59 = vpop.f32.mrb[3].mxu0  ;;  %v575_v61 = vmax.f32 %v537_v54, 0.0 }
 0x19b   : > { %v543_v60 = vadd.f32 %v542_v59, %v419_v52  ;;  %v576_v63 = vmax.f32 %v539_v56, 0.0  ;;  %v593_v56 = vld [vmem:[#allocation2 + $0x10] sm:$0xff] }
 0x19c   : > { %v577_v62 = vmax.f32 %v541_v58, 0.0 }
 0x19d   : > { %v578_v0 = vmax.f32 %v543_v60, 0.0  ;;  %v594_v60 = vld [vmem:[#allocation2 + $0x18] sm:$0xff] }
 0x19e   : > { %v599_v1 = vpack.c.bf16 %v577_v62, %v575_v61 }
 0x19f   : > { %v546_v2 = vpop.f32.mrb[4].mxu0  ;;  %v600_v3 = vpack.c.bf16 %v578_v0, %v576_v63 }
 0x1a0   : > { %v547_v4 = vadd.f32 %v546_v2, %v415_v51  ;;  %v548_v5 = vpop.f32.mrb[5].mxu0  ;;  %v595_v2 = vld [vmem:[#allocation2 + $0x20] sm:$0xff] }
 0x1a1   : > { %v549_v6 = vadd.f32 %v548_v5, %v419_v52  ;;  %v550_v7 = vpop.f32.mrb[6].mxu0  ;;  %767 = vmatprep.mubr.bf16.mxu1 %v600_v3 }
 0x1a2   : > { %v551_v8 = vadd.f32 %v550_v7, %v415_v51  ;;  %v552_v9 = vpop.f32.mrb[7].mxu0  ;;  %768 = vmatmul.mubr.bf16.vlgmr.msra.gmra.mrb[0].mxu1 %v599_v1  ;;  %v579_v11 = vmax.f32 %v547_v4, 0.0 }
 0x1a3   : > { %v553_v10 = vadd.f32 %v552_v9, %v419_v52  ;;  %v580_v13 = vmax.f32 %v549_v6, 0.0  ;;  %v596_v6 = vld [vmem:[#allocation2 + $0x28] sm:$0xff] }
 0x1a4   : > { %v581_v12 = vmax.f32 %v551_v8, 0.0 }
 0x1a5   : > { %v582_v14 = vmax.f32 %v553_v10, 0.0 }
 0x1a6   : > { %v601_v15 = vpack.c.bf16 %v581_v12, %v579_v11  ;;  %v597_v12 = vld [vmem:[#allocation2 + $0x30] sm:$0xff] }
 0x1a7   : > { %v602_v16 = vpack.c.bf16 %v582_v14, %v580_v13  ;;  %v556_v17 = vpop.f32.mrb[8].mxu0 }
 0x1a8   : > { %v557_v18 = vadd.f32 %v556_v17, %v415_v51  ;;  %v558_v19 = vpop.f32.mrb[9].mxu0 }
 0x1a9   : > { %v559_v20 = vadd.f32 %v558_v19, %v419_v52  ;;  %v560_v21 = vpop.f32.mrb[10].mxu0  ;;  %775 = vmatprep.mubr.bf16.mxu1 %v602_v16  ;;  %v598_v16 = vld [vmem:[#allocation2 + $0x38] sm:$0xff] }
 0x1aa   : > { %v561_v22 = vadd.f32 %v560_v21, %v415_v51  ;;  %v562_v23 = vpop.f32.mrb[11].mxu0  ;;  %776 = vmatmul.mubr.bf16.gmra.mrb[4].mxu1 %v601_v15  ;;  %v583_v25 = vmax.f32 %v557_v18, 0.0 }
 0x1ab   : > { %v563_v24 = vadd.f32 %v562_v23, %v419_v52  ;;  %v584_v27 = vmax.f32 %v559_v20, 0.0 }
 0x1ac   : > { %v585_v26 = vmax.f32 %v561_v22, 0.0  ;;  %v1064_v22 = vld [vmem:[%s1951_s4] ss:$0 sm:$0xff] (!%p1063_p4) }
 0x1ad   : > { %v586_v28 = vmax.f32 %v563_v24, 0.0 }
 0x1ae   : > { %v603_v29 = vpack.c.bf16 %v585_v26, %v583_v25 }
 0x1af   : > { %v604_v30 = vpack.c.bf16 %v586_v28, %v584_v27  ;;  %v566_v31 = vpop.f32.mrb[12].mxu0 }
 0x1b0   : > { %v567_v32 = vadd.f32 %v566_v31, %v415_v51  ;;  %v568_v33 = vpop.f32.mrb[13].mxu0 }
 0x1b1   : > { %v569_v34 = vadd.f32 %v568_v33, %v419_v52  ;;  %v570_v35 = vpop.f32.mrb[14].mxu0  ;;  %783 = vmatprep.mubr.bf16.mxu1 %v604_v30 }
 0x1b2   : > { %v571_v36 = vadd.f32 %v570_v35, %v415_v51  ;;  %v572_v37 = vpop.f32.mrb[15].mxu0  ;;  %784 = vmatmul.mubr.bf16.gmra.mrb[8].mxu1 %v603_v29  ;;  %v587_v39 = vmax.f32 %v567_v32, 0.0 }
 0x1b3   : > { %v573_v38 = vadd.f32 %v572_v37, %v419_v52  ;;  %v588_v41 = vmax.f32 %v569_v34, 0.0 }
 0x1b4   : > { %v589_v40 = vmax.f32 %v571_v36, 0.0 }
 0x1b5   : > { %v590_v42 = vmax.f32 %v573_v38, 0.0 }
 0x1b6   : > { %v605_v43 = vpack.c.bf16 %v589_v40, %v587_v39 }
 0x1b7   : > { %v606_v44 = vpack.c.bf16 %v590_v42, %v588_v41 }
 0x1b9   : > { %791 = vmatprep.mubr.bf16.mxu1 %v606_v44 }
 0x1ba   : > { %792 = vmatmul.mubr.bf16.gmra.mrb[12].mxu1 %v605_v43 }
 0x275   : > { %v1094_v45 = vpop.f32.mrb[0].mxu1 }
 0x276   : > { %v1095_v47 = vpop.f32.mrb[1].mxu1 }
 0x277   : > { %v1096_v48 = vadd.f32 %v1095_v47, %v1094_v45  ;;  %v1097_v49 = vpop.f32.mrb[2].mxu1 }
 0x278   : > { %v1098_v53 = vpop.f32.mrb[3].mxu1 }
 0x279   : > { %v800_v54 = vadd.f32 %v1096_v48, %v591_v46  ;;  %v1099_v51 = vadd.f32 %v1098_v53, %v1097_v49 }
 0x27b   : > { %808 = vst [vmem:[#allocation2] sm:$0xff] %v800_v54  ;;  %v801_v55 = vadd.f32 %v1099_v51, %v592_v50 }
 0x27d   : > { %809 = vst [vmem:[#allocation2 + $0x8] sm:$0xff] %v801_v55  ;;  %v1100_v52 = vpop.f32.mrb[4].mxu1 }
 0x27e   : > { %v1101_v57 = vpop.f32.mrb[5].mxu1 }
 0x27f   : > { %v1102_v58 = vadd.f32 %v1101_v57, %v1100_v52  ;;  %v1103_v59 = vpop.f32.mrb[6].mxu1 }
 0x280   : > { %v1104_v61 = vpop.f32.mrb[7].mxu1 }
 0x281   : > { %v802_v62 = vadd.f32 %v1102_v58, %v593_v56  ;;  %v1105_v63 = vadd.f32 %v1104_v61, %v1103_v59 }
 0x282   : > { %v820_v21 = vld [vmem:[#allocation2] sm:$0xff] (!%p1063_p4) }
 0x283   : > { %810 = vst [vmem:[#allocation2 + $0x10] sm:$0xff] %v802_v62  ;;  %v803_v0 = vadd.f32 %v1105_v63, %v594_v60  ;;  %v835_v24 = vadd.f32 (!%p1063_p4), %v1064_v22, %v820_v21 }
 0x284   : > { %v821_v23 = vld [vmem:[#allocation2 + $0x8] sm:$0xff] (!%p1063_p4) }
 0x285   : > { %811 = vst [vmem:[#allocation2 + $0x18] sm:$0xff] %v803_v0  ;;  %v1106_v1 = vpop.f32.mrb[8].mxu1  ;;  %v836_v25 = vadd.f32 (!%p1063_p4), %v1064_v22, %v821_v23  ;;  %843 = vst [vmem:[%s1801_s9] sm:$0xff] (!%p1063_p4), %v835_v24 }
 0x286   : > { %v1107_v3 = vpop.f32.mrb[9].mxu1 }
 0x287   : > { %v1108_v4 = vadd.f32 %v1107_v3, %v1106_v1  ;;  %v1109_v5 = vpop.f32.mrb[10].mxu1  ;;  %844 = vst [vmem:[%s1801_s9 + $0x8] sm:$0xff] (!%p1063_p4), %v836_v25 }
 0x288   : > { %v1110_v7 = vpop.f32.mrb[11].mxu1 }
 0x289   : > { %v804_v8 = vadd.f32 %v1108_v4, %v595_v2  ;;  %v1111_v9 = vadd.f32 %v1110_v7, %v1109_v5 }
 0x28a   : > { %v822_v26 = vld [vmem:[#allocation2 + $0x10] sm:$0xff] (!%p1063_p4) }
 0x28b   : > { %812 = vst [vmem:[#allocation2 + $0x20] sm:$0xff] %v804_v8  ;;  %v805_v10 = vadd.f32 %v1111_v9, %v596_v6  ;;  %v837_v29 = vadd.f32 (!%p1063_p4), %v1064_v22, %v822_v26 }
 0x28c   : > { %v823_v27 = vld [vmem:[#allocation2 + $0x18] sm:$0xff] (!%p1063_p4) }
 0x28d   : > { %813 = vst [vmem:[#allocation2 + $0x28] sm:$0xff] %v805_v10  ;;  %v1112_v11 = vpop.f32.mrb[12].mxu1  ;;  %v838_v30 = vadd.f32 (!%p1063_p4), %v1064_v22, %v823_v27  ;;  %845 = vst [vmem:[%s1801_s9 + $0x10] sm:$0xff] (!%p1063_p4), %v837_v29 }
 0x28e   : > { %v1113_v13 = vpop.f32.mrb[13].mxu1 }
 0x28f   : > { %v1114_v14 = vadd.f32 %v1113_v13, %v1112_v11  ;;  %v1115_v15 = vpop.f32.mrb[14].mxu1  ;;  %819 = sbr.rel (%p1063_p4) target bundleno = 672 (0x2a0), region = 60  ;;  %846 = vst [vmem:[%s1801_s9 + $0x18] sm:$0xff] (!%p1063_p4), %v838_v30 }
 0x290   : > { %v1116_v17 = vpop.f32.mrb[15].mxu1 }
 0x291   : > { %v806_v18 = vadd.f32 %v1114_v14, %v597_v12  ;;  %v1117_v19 = vadd.f32 %v1116_v17, %v1115_v15 }
 0x292   : > { %v824_v28 = vld [vmem:[#allocation2 + $0x20] sm:$0xff] (!%p1063_p4) }
 0x293   : > { %814 = vst [vmem:[#allocation2 + $0x30] sm:$0xff] %v806_v18  ;;  %v807_v20 = vadd.f32 %v1117_v19, %v598_v16  ;;  %v839_v31 = vadd.f32 (!%p1063_p4), %v1064_v22, %v824_v28 }
 0x294   : > { %v825_v32 = vld [vmem:[#allocation2 + $0x28] sm:$0xff] (!%p1063_p4) }
 0x295   : > { %815 = vst [vmem:[#allocation2 + $0x38] sm:$0xff] %v807_v20  ;;  %v840_v35 = vadd.f32 (!%p1063_p4), %v1064_v22, %v825_v32  ;;  %847 = vst [vmem:[%s1801_s9 + $0x20] sm:$0xff] (!%p1063_p4), %v839_v31 }
 0x297   : > { %848 = vst [vmem:[%s1801_s9 + $0x28] sm:$0xff] %v840_v35 }
 0x29a   : > { %v826_v33 = vld [vmem:[#allocation2 + $0x30] sm:$0xff] }
 0x29b   : > { %v841_v36 = vadd.f32 %v1064_v22, %v826_v33 }
 0x29c   : > { %v827_v34 = vld [vmem:[#allocation2 + $0x38] sm:$0xff] }
 0x29d   : > { %v842_v37 = vadd.f32 %v1064_v22, %v827_v34  ;;  %849 = vst [vmem:[%s1801_s9 + $0x30] sm:$0xff] %v841_v36 }
 0x29f   : > { %850 = vst [vmem:[%s1801_s9 + $0x38] sm:$0xff] %v842_v37 }
 0x2a0 PF: > { %s852_s24 = scalar_lea.sflag [#allocation5], %s1774_s21  ;;  %p1979_p13 = scmp.ne.s32.totalorder %s1973_s10, 0 }
 0x2a1   : > { %s1066_s8 = sshll.u32 (%p1979_p13), %s1466_s25, 3 }
 0x2a2   : > { %858 = sbr.rel (!%p1979_p13) target bundleno = 709 (0x2c5), region = 64  ;;  %s860_s11 = ssub.s32 (%p1979_p13), 18, %s1066_s8 }
 0x2a3   : > { %p861_p3 = scmp.lt.s32.totalorder (%p1979_p13), %s860_s11, 8 }
 0x2a9   : > { %s2007_s11 = smov (!%p861_p3, %s860_s11), 8 }
 0x2aa   : > { %s1869_s16 = sshll.u32 %s2007_s11, 7 }
 0x2ab   : > { %s865_s30 = ssub.s32 1024, %s1869_s16 }
 0x2ac   : > { %866 = vsyncadd %s852_s24, %s865_s30  ;;  %p1068_p11 = scmp.ne.s32.totalorder %s1869_s16, 0  ;;  %s1077_s10 = sshll.u32 %s1466_s25, 10 }
 0x2ad   : > { %s1879_s13 = scalar_lea.hbm %s1952_s5, %s1077_s10  ;;  %s871_s23 = sshll.u32 %s1801_s9, 4  ;;  %s1882_s23 = int_to_ptr.vmem [resolvable:$true] %s871_s23 }
 0x2ae   : > { %s1352_s12 = scalar_lea.vmem %s1882_s23, %s1869_s16  ;;  %s1492_s14 = smov [#allocation9]  }
 0x2af   : > { %p1353_p10 = scmp.ne.s32.totalorder %s1882_s23, %s1352_s12  ;;  %s1356_s29 = sshll.u32 %s1492_s14, 4  ;;  %s1357_s29 = int_to_ptr.vmem [resolvable:$false] %s1356_s29 }
 0x2b0   : > { %s1358_s25 = scalar_lea.vmem %s1357_s29, 2048  ;;  %p1359_p9 = scmp.lt.s32.totalorder %s1882_s23, %s1357_s29 }
 0x2b1   : > { %p1354_p2 = pnand %p1353_p10, %p1068_p11  ;;  %p1360_p1 = scmp.lt.s32.totalorder %s1358_s25, %s1352_s12 }
 0x2b3   : > { %p1355_p6 = pneg %p1354_p2  ;;  %p1361_p0 = por %p1360_p1, %p1359_p9 }
 0x2b5   : > { %p1362_p5 = pnand %p1361_p0, %p1355_p6 }
 0x2b7   : > { %1365 = shalt.err (!%p1362_p5)
}
 0x2b8   : > { %s1366_s18 = scalar_lea.hbm %s1879_s13, %s1869_s16  ;;  %s1370_s0 = scalar_lea.hbm %s1952_s5, 2304 }
 0x2b9   : > { %p1367_p12 = scmp.ne.s32.totalorder %s1879_s13, %s1366_s18  ;;  %p1371_p4 = scmp.lt.u32.totalorder %s1879_s13, %s1952_s5 }
 0x2ba   : > { %p1372_p13 = scmp.lt.u32.totalorder %s1370_s0, %s1366_s18  ;;  %p1374_p10 = scmp.lt.u32.totalorder %s1366_s18, %s1879_s13 }
 0x2bb   : > { %p1368_p8 = pnand %p1367_p12, %p1068_p11 }
 0x2bc   : > { %p1373_p3 = por %p1372_p13, %p1371_p4 }
 0x2bd   : > { %p1369_p7 = pneg %p1368_p8 }
 0x2be   : > { %p1375_p2 = por %p1374_p10, %p1373_p3 }
 0x2c0   : > { %p1376_p6 = pnand %p1375_p2, %p1369_p7 }
 0x2c2   : > { %1379 = shalt.err (!%p1376_p6)
}
 0x2c3   : > { %s1493_s8 = smov 128   ;;  %s1494_s11 = smov 8  }
 0x2c4   : > { %877 = dma.vmem_to_hbm [thread:$0]  (%p1068_p11), %s1882_s23, %s1869_s16, %s1879_s13, %s852_s24, %s1493_s8, %s1493_s8, %s1494_s11  }
 0x2c5 PF: > { %s1980_s30 = sld [smem:[#allocation13_spill]]  ;;  %s1981_s10 = sld [smem:[#allocation20_spill]] }
 0x2c6   : > { %p1128_p9 = scmp.ge.s32.totalorder %s1478_s28, 2 }
 0x2cb   : > { %s886_s6 = sand.u32 1, %s1980_s30   ;;  %p1982_p1 = scmp.ne.s32.totalorder %s1981_s10, 0 }
 0x2cc   : > { %s887_s27 = scalar_lea.sflag [#allocation5], %s886_s6 }
 0x2cd   : > { %p1125_p0 = pnand %p1128_p9, %p1982_p1 }
 0x2cf   : > { %1433 = dma.done.wait (!%p1125_p0), %s887_s27, 1024  }
 0x2d0   : > { %1435 = vsyncadd (!%p1125_p0), %s887_s27, 4294966272  ;;  %s24_s28 = sadd.s32 1, %s1478_s28   ;;  %s1983_s12 = sld [smem:[#allocation18_spill]] }
 0x2d1   : > { %p21_p5 = scmp.ge.s32.totalorder %s24_s28, 8   ;;  %s1984_s24 = sld [smem:[#allocation14_spill]] }
 0x2d2   : > { %s1985_s23 = sld [smem:[#allocation19_spill]]  ;;  %s1986_s25 = sld [smem:[#allocation15_spill]] }
 0x2d3   : > { %s1987_s16 = sld [smem:[#allocation16_spill]]  ;;  %s1988_s27 = sld [smem:[#allocation17_spill]] }
 0x2d4   : > { %s1989_s18 = smov %s1442_s19  ;;  %s1990_s19 = smov %s1446_s20 }
 0x2d5   : > { %s1992_s21 = smov %s1454_s22  ;;  %23 = sbr.rel (!%p21_p5) target bundleno = 13 (0xd), region = 120 }
 0x2d6   : > { %s1991_s20 = smov %s1983_s12 }
 0x2d7   : > { %s1993_s22 = smov %s1984_s24  ;;  %s1994_s24 = smov %s1470_s26 }
 0x2d9   : > { %s1995_s26 = smov %s1987_s16 }
 0x2dc   :  { %892 = vsyncpa [#allocation4], 1 }
 0x2dd   :  { %894 = vsyncpa [#allocation4 + $0x1], 1 }
 0x2de   :  { %895 = vsyncpa [#allocation7], 1 }
 0x2df   :  { %897 = vsyncpa [#allocation7 + $0x1], 1 }
 0x2e0   :  { %898 = vsyncpa [#allocation5], 1 }
 0x2e1   :  { %900 = vsyncpa [#allocation5 + $0x1], 1 }

</bundles_post_ra>
